<compile_context>
chip_gen: v5e
topology: v5e:2x2
jax: 0.10.0
libtpu: 0.0.40
codegen_flags: <defaults>
</compile_context>

<pallas_src>
import jax
import jax.numpy as jnp
from jax.experimental import pallas as pl
from jax.experimental.pallas import tpu as pltpu


def _round_up(x, m):
    return ((x + m - 1) // m) * m


def _cdiv(a, b):
    return -(-a // b)


def _logreg_kernel(x_ref, w_ref, b_ref, o_ref):
    # x_ref: (TILE_N, ft_in)  bf16 streamed row tile
    # w_ref: (ft_in, C_pad)   bf16 resident weight (pre-transposed in wrapper)
    # b_ref: (1, C_pad)       f32 resident bias
    # o_ref: (TILE_N, C_pad)  f32 output tile
    acc = jnp.dot(x_ref[...], w_ref[...], preferred_element_type=jnp.float32)
    o_ref[...] = (acc + b_ref[...]).astype(o_ref.dtype)


def logreg_forward(seq, weight, bias, *, max_tile_n=2048):
    """seq: [N, ft_in], weight: [C, ft_in], bias: [C] -> [N, C]  (= seq @ W.T + b)."""
    n, ft_in = seq.shape
    nb_classes = weight.shape[0]

    # Lane-dense output: pad classes to a multiple of 128 (zeros; sliced off).
    c_pad = _round_up(nb_classes, 128)

    # Streamed operands in bf16, accumulation/epilogue/output in f32.
    x = seq.astype(jnp.bfloat16)
    wt = weight.T.astype(jnp.bfloat16)                       # [ft_in, C] once, in wrapper
    if c_pad != nb_classes:
        wt = jnp.pad(wt, ((0, 0), (0, c_pad - nb_classes)))
    b = jnp.pad(bias.astype(jnp.float32), (0, c_pad - nb_classes)).reshape(1, c_pad)

    x_item, w_item, b_item, out_item = 2, 2, 4, 4            # bytes per element

    # Generation-gated VMEM budget; the same number sizes the tile and the limit.
    try:
        vmem_cap = int(pltpu.get_tpu_info().vmem_capacity_bytes)
    except Exception:
        vmem_cap = 64 << 20                                  # conservative (v7x-sized)
    vmem_target = min(vmem_cap * 3 // 4, 100 << 20)          # 48 MiB v7x, 96 MiB v5e/v6e

    headroom = 2 << 20
    per_row = 2 * ft_in * x_item + 2 * c_pad * out_item      # double-buffered x + out
    fixed = 2 * ft_in * c_pad * w_item + 2 * c_pad * b_item  # conservative (2 bufs) W + bias
    avail = vmem_target - fixed - headroom

    tile_n = max(8, min(max_tile_n, avail // per_row if avail > 0 else 8))
    tile_n = max(8, (tile_n // 8) * 8)
    tile_n = min(tile_n, _round_up(n, 8))
    # Give both v7x TensorCores work whenever N allows >=2 tiles.
    if n > 8 and _cdiv(n, tile_n) < 2:
        tile_n = max(8, _round_up(_cdiv(n, 2), 8))

    grid = (_cdiv(n, tile_n),)                               # no row padding of seq

    vmem_need = fixed + headroom + tile_n * per_row
    vmem_limit = int(min(max(vmem_target, vmem_need), vmem_cap * 9 // 10))

    cost = pl.CostEstimate(
        flops=2 * n * ft_in * c_pad,
        bytes_accessed=(n * ft_in * x_item + ft_in * c_pad * w_item
                        + c_pad * b_item + n * c_pad * out_item),
        transcendentals=0,
    )

    def _run(single_buffer_resident):
        if single_buffer_resident and hasattr(pl, "Buffered"):
            w_spec = pl.BlockSpec((ft_in, c_pad), lambda i: (0, 0),
                                  pipeline_mode=pl.Buffered(1))
            b_spec = pl.BlockSpec((1, c_pad), lambda i: (0, 0),
                                  pipeline_mode=pl.Buffered(1))
        else:
            w_spec = pl.BlockSpec((ft_in, c_pad), lambda i: (0, 0))
            b_spec = pl.BlockSpec((1, c_pad), lambda i: (0, 0))
        return pl.pallas_call(
            _logreg_kernel,
            out_shape=jax.ShapeDtypeStruct((n, c_pad), jnp.float32),
            grid_spec=pltpu.PrefetchScalarGridSpec(
                num_scalar_prefetch=0,
                grid=grid,
                in_specs=[
                    pl.BlockSpec((tile_n, ft_in), lambda i: (i, 0)),   # streamed rows
                    w_spec,                                            # resident W^T
                    b_spec,                                            # resident bias
                ],
                out_specs=pl.BlockSpec((tile_n, c_pad), lambda i: (i, 0)),
            ),
            compiler_params=pltpu.CompilerParams(
                dimension_semantics=("parallel",),    # row tiles are independent
                vmem_limit_bytes=vmem_limit,
            ),
            cost_estimate=cost,
        )(x, wt, b)

    try:
        out = _run(True)
    except Exception:
        out = _run(False)   # fall back to default double-buffered resident operands

    return out[:, :nb_classes]


def init_logreg_params(key, ft_in, nb_classes):
    # Xavier uniform on W ([nb_classes, ft_in]), zero bias — matches
    # torch.nn.init.xavier_uniform_ + bias.fill_(0.0).
    bound = (6.0 / (ft_in + nb_classes)) ** 0.5
    w = jax.random.uniform(key, (nb_classes, ft_in), jnp.float32, -bound, bound)
    b = jnp.zeros((nb_classes,), jnp.float32)
    return w, b


if __name__ == "__main__":
    key = jax.random.PRNGKey(0)
    k_x, k_w = jax.random.split(key)

    N, FT_IN, NB_CLASSES = 8, 32, 8   # small synthetic shapes
    seq = jax.random.normal(k_x, (N, FT_IN), jnp.float32)
    weight, bias = init_logreg_params(k_w, FT_IN, NB_CLASSES)

    out = logreg_forward(seq, weight, bias)
    out = jax.block_until_ready(out)
    assert out.shape == (N, NB_CLASSES)

    # Reference with the same bf16 inputs / f32 accumulation as the kernel.
    ref_bf16 = (jnp.dot(seq.astype(jnp.bfloat16), weight.T.astype(jnp.bfloat16),
                        preferred_element_type=jnp.float32) + bias)
    assert jnp.allclose(out, ref_bf16, atol=1e-2, rtol=1e-2)

    # Sanity vs. full-precision nn.Linear math (loose tolerance: bf16 inputs).
    ref_f32 = seq @ weight.T + bias
    assert jnp.allclose(out, ref_f32, atol=5e-2, rtol=5e-2)

    print("KERNEL_OK")
</pallas_src>

<mosaic_0001>
module attributes {stable_mosaic.version = 11 : i64} {
  func.func @_logreg_kernel(%arg0: i32, %arg1: memref<8x32xbf16, #tpu.memory_space<vmem>>, %arg2: memref<32x128xbf16, #tpu.memory_space<vmem>>, %arg3: memref<1x128xf32, #tpu.memory_space<vmem>>, %arg4: memref<8x128xf32, #tpu.memory_space<vmem>>) attributes {dimension_semantics = [#tpu.dimension_semantics<parallel>], iteration_bounds = array<i64: 1>, scalar_prefetch = 0 : i64, scratch_operands = 0 : i64, tpu.core_type = #tpu.core_type<tc>, window_params = [{transform_indices = @transform_0, window_bounds = array<i64: 8, 32>}, {pipeline_mode = #tpu.pipeline_mode<synchronous>, transform_indices = @transform_1, window_bounds = array<i64: 32, 128>}, {pipeline_mode = #tpu.pipeline_mode<synchronous>, transform_indices = @transform_2, window_bounds = array<i64: 1, 128>}, {transform_indices = @transform_3, window_bounds = array<i64: 8, 128>}]} {
    %c0 = arith.constant 0 : index
    %c0_0 = arith.constant 0 : index
    %0 = vector.load %arg1[%c0, %c0_0] : memref<8x32xbf16, #tpu.memory_space<vmem>>, vector<8x32xbf16>
    %c0_1 = arith.constant 0 : index
    %c0_2 = arith.constant 0 : index
    %1 = vector.load %arg2[%c0_1, %c0_2] : memref<32x128xbf16, #tpu.memory_space<vmem>>, vector<32x128xbf16>
    %cst = arith.constant dense<0.000000e+00> : vector<8x128xf32>
    %2 = tpu.matmul %0, %1, %cst {dimension_numbers = #tpu.dot_dimension_numbers<[1], [0], [0], [1], [0, 0, 1, 1], [], []>} : vector<8x32xbf16>, vector<32x128xbf16>, vector<8x128xf32> -> vector<8x128xf32>
    %c0_3 = arith.constant 0 : index
    %c0_4 = arith.constant 0 : index
    %3 = vector.load %arg3[%c0_3, %c0_4] : memref<1x128xf32, #tpu.memory_space<vmem>>, vector<1x128xf32>
    %4 = vector.broadcast %3 : vector<1x128xf32> to vector<8x128xf32>
    %5 = arith.addf %2, %4 : vector<8x128xf32>
    %c0_5 = arith.constant 0 : index
    %c0_6 = arith.constant 0 : index
    %6 = vector.load %arg4[%c0_5, %c0_6] : memref<8x128xf32, #tpu.memory_space<vmem>>, vector<8x128xf32>
    tpu.vector_store %arg4[%c0_5, %c0_6], %5 {strides = array<i32>} : memref<8x128xf32, #tpu.memory_space<vmem>>, vector<8x128xf32>,
    return
  }
  func.func @transform_0(%arg0: i32) -> (i32, i32) {
    %c0_i32 = arith.constant 0 : i32
    %c0_i32_0 = arith.constant 0 : i32
    return %arg0, %c0_i32 : i32, i32
  }
  func.func @transform_1(%arg0: i32) -> (i32, i32) {
    %c0_i32 = arith.constant 0 : i32
    %c0_i32_0 = arith.constant 0 : i32
    %c0_i32_1 = arith.constant 0 : i32
    return %c0_i32, %c0_i32_0 : i32, i32
  }
  func.func @transform_2(%arg0: i32) -> (i32, i32) {
    %c0_i32 = arith.constant 0 : i32
    %c0_i32_0 = arith.constant 0 : i32
    %c0_i32_1 = arith.constant 0 : i32
    return %c0_i32, %c0_i32_0 : i32, i32
  }
  func.func @transform_3(%arg0: i32) -> (i32, i32) {
    %c0_i32 = arith.constant 0 : i32
    %c0_i32_0 = arith.constant 0 : i32
    return %arg0, %c0_i32 : i32, i32
  }
}

module attributes {stable_mosaic.version = 11 : i64} {
  func.func @_logreg_kernel(%arg0: i32, %arg1: memref<8x32xbf16, #tpu.memory_space<vmem>>, %arg2: memref<32x128xbf16, #tpu.memory_space<vmem>>, %arg3: memref<1x128xf32, #tpu.memory_space<vmem>>, %arg4: memref<8x128xf32, #tpu.memory_space<vmem>>) attributes {dimension_semantics = [#tpu.dimension_semantics<parallel>], iteration_bounds = array<i64: 1>, scalar_prefetch = 0 : i64, scratch_operands = 0 : i64, tpu.core_type = #tpu.core_type<tc>, window_params = [{transform_indices = @transform_0, window_bounds = array<i64: 8, 32>}, {pipeline_mode = #tpu.pipeline_mode<synchronous>, transform_indices = @transform_1, window_bounds = array<i64: 32, 128>}, {pipeline_mode = #tpu.pipeline_mode<synchronous>, transform_indices = @transform_2, window_bounds = array<i64: 1, 128>}, {transform_indices = @transform_3, window_bounds = array<i64: 8, 128>}]} {
    %c0 = arith.constant 0 : index
    %c0_0 = arith.constant 0 : index
    %0 = vector.load %arg1[%c0, %c0_0] : memref<8x32xbf16, #tpu.memory_space<vmem>>, vector<8x32xbf16>
    %c0_1 = arith.constant 0 : index
    %c0_2 = arith.constant 0 : index
    %1 = vector.load %arg2[%c0_1, %c0_2] : memref<32x128xbf16, #tpu.memory_space<vmem>>, vector<32x128xbf16>
    %cst = arith.constant dense<0.000000e+00> : vector<8x128xf32>
    %2 = tpu.matmul %0, %1, %cst {dimension_numbers = #tpu.dot_dimension_numbers<[1], [0], [0], [1], [0, 0, 1, 1], [], []>} : vector<8x32xbf16>, vector<32x128xbf16>, vector<8x128xf32> -> vector<8x128xf32>
    %c0_3 = arith.constant 0 : index
    %c0_4 = arith.constant 0 : index
    %3 = vector.load %arg3[%c0_3, %c0_4] : memref<1x128xf32, #tpu.memory_space<vmem>>, vector<1x128xf32>
    %4 = vector.broadcast %3 : vector<1x128xf32> to vector<8x128xf32>
    %5 = arith.addf %2, %4 : vector<8x128xf32>
    %c0_5 = arith.constant 0 : index
    %c0_6 = arith.constant 0 : index
    %6 = vector.load %arg4[%c0_5, %c0_6] : memref<8x128xf32, #tpu.memory_space<vmem>>, vector<8x128xf32>
    tpu.vector_store %arg4[%c0_5, %c0_6], %5 {strides = array<i32>} : memref<8x128xf32, #tpu.memory_space<vmem>>, vector<8x128xf32>,
    return
  }
  func.func @transform_0(%arg0: i32) -> (i32, i32) {
    %c0_i32 = arith.constant 0 : i32
    %c0_i32_0 = arith.constant 0 : i32
    return %arg0, %c0_i32 : i32, i32
  }
  func.func @transform_1(%arg0: i32) -> (i32, i32) {
    %c0_i32 = arith.constant 0 : i32
    %c0_i32_0 = arith.constant 0 : i32
    %c0_i32_1 = arith.constant 0 : i32
    return %c0_i32, %c0_i32_0 : i32, i32
  }
  func.func @transform_2(%arg0: i32) -> (i32, i32) {
    %c0_i32 = arith.constant 0 : i32
    %c0_i32_0 = arith.constant 0 : i32
    %c0_i32_1 = arith.constant 0 : i32
    return %c0_i32, %c0_i32_0 : i32, i32
  }
  func.func @transform_3(%arg0: i32) -> (i32, i32) {
    %c0_i32 = arith.constant 0 : i32
    %c0_i32_0 = arith.constant 0 : i32
    return %arg0, %c0_i32 : i32, i32
  }
}

</mosaic_0001>

<bundles_post_ra>
// kernel: tpu_custom_call.1
= control target key start
LH: loop header
LB: loop body
LE: loop exit
PB: predicated region body
PF: predicated region fallthrough
CT: control target
= control target key end

     0   :  { %8 = vsyncpa [#allocation3], 0  ;;  %s235_s0 = inlined_call_operand.hbm [shape: bf16[8,32], index: 0, kind: input, shape index: {}]   ;;  %s236_s1 = inlined_call_operand.hbm [shape: bf16[32,128], index: 1, kind: input, shape index: {}]   ;;  %s237_s2 = inlined_call_operand.vmem [shape: f32[1,128], index: 2, kind: input, shape index: {}]   ;;  %s238_s3 = inlined_call_operand.hbm [shape: f32[8,128], index: 3, kind: output, shape index: {}]  }
   0x1   :  { %9 = vsyncpa [#allocation6], 0 }
   0x2   :  { %10 = vsyncpa [#allocation4], 0  ;;  %s16_s14 = sshll.u32 %s235_s0, 4  ;;  %s198_s15 = smov [#allocation2]   ;;  %s17_s14 = int_to_ptr.hbm [resolvable:$true] %s16_s14 }
   0x3   :  { %s18_s16 = sshll.u32 %s198_s15, 4  ;;  %s26_s19 = sshll.u32 %s236_s1, 4  ;;  %s19_s16 = int_to_ptr.vmem [resolvable:$true] %s18_s16  ;;  %s27_s19 = int_to_ptr.hbm [resolvable:$true] %s26_s19 }
   0x4   :  { %21 = dma.hbm_to_vmem [thread:$0]  %s17_s14, 64, %s19_s16, [#allocation3]  }
   0x5   :  { %s199_s20 = smov [#allocation5]   ;;  %s200_s22 = smov 64  }
   0x6   :  { %s28_s21 = sshll.u32 %s199_s20, 4  ;;  %s201_s23 = smov 4   ;;  %s29_s21 = int_to_ptr.vmem [resolvable:$true] %s28_s21 }
   0x7   :  { %34 = dma.hbm_to_vmem [thread:$0]  %s27_s19, 256, %s29_s21, [#allocation6], %s200_s22, %s200_s22, %s201_s23  }
   0x8   :  { %192 = dma.done.wait [#allocation3], 64  }
   0x9   :  { %193 = vsyncadd [#allocation3], 4294967232 }
   0xa   :  { %194 = dma.done.wait [#allocation6], 256  }
   0xb   :  { %195 = vsyncadd [#allocation6], 4294967040  ;;  %v113_v0 = vld [vmem:[#allocation5 + $0x8] sm:$0xff]  ;;  %v112_v1 = vld [vmem:[#allocation5] sm:$0xff]  ;;  %vm67_vm0 = vcmask 261120   ;;  %s202_s24 = smov [#allocation7]  }
   0xc   :  { %77 = vmatpush.bf16.msra.mxu0 %v113_v0  ;;  %v46_v2 = vld [vmem:[#allocation2] sm:$0xf]  ;;  %s90_s25 = sshll.u32 %s202_s24, 4  ;;  %s92_s28 = sshll.u32 %s238_s3, 4  ;;  %s91_s25 = int_to_ptr.vmem [resolvable:$true] %s90_s25  ;;  %s93_s28 = int_to_ptr.hbm [resolvable:$true] %s92_s28 }
   0xd   :  { %v119_v3 = vld [vmem:[%s237_s2] ss:$0 sm:$0xff] }
  0x10   :  { %78 = vmatpush.bf16.msra.mxu0 %v112_v1 }
  0x13   :  { %111 = vmatmul.msk.bf16.vlgmr.msra.gmra.mxu0 %vm67_vm0, %v46_v2 }
  0x90   :  { %v80_v4 = vpop.f32.mrf.mxu0 }
  0x91   :  { %v81_v5 = vadd.f32 %v119_v3, %v80_v4 }
  0x93   :  { %84 = vst [vmem:[#allocation7] sm:$0xff] %v81_v5 }
  0x94   :  { %95 = dma.vmem_to_hbm [thread:$0]  %s91_s25, 128, %s93_s28, [#allocation4]  }
  0x98   :  { %v82_v6 = vpop.f32.mrf.mxu0 }
  0x99   :  { %196 = dma.done.wait [#allocation4], 128  }
  0x9a   :  { %197 = vsyncadd [#allocation4], 4294967168 }
  0x9b   :  { %100 = vsyncpa [#allocation3], 1 }
  0x9c   :  { %101 = vsyncpa [#allocation6], 1 }
  0x9d   :  { %102 = vsyncpa [#allocation4], 1 }

// kernel: tpu_custom_call.1
= control target key start
LH: loop header
LB: loop body
LE: loop exit
PB: predicated region body
PF: predicated region fallthrough
CT: control target
= control target key end

     0   :  { %8 = vsyncpa [#allocation3], 0  ;;  %s235_s0 = inlined_call_operand.hbm [shape: bf16[8,32], index: 0, kind: input, shape index: {}]   ;;  %s236_s1 = inlined_call_operand.hbm [shape: bf16[32,128], index: 1, kind: input, shape index: {}]   ;;  %s237_s2 = inlined_call_operand.vmem [shape: f32[1,128], index: 2, kind: input, shape index: {}]   ;;  %s238_s3 = inlined_call_operand.hbm [shape: f32[8,128], index: 3, kind: output, shape index: {}]  }
   0x1   :  { %9 = vsyncpa [#allocation6], 0 }
   0x2   :  { %10 = vsyncpa [#allocation4], 0  ;;  %s16_s14 = sshll.u32 %s235_s0, 4  ;;  %s198_s15 = smov [#allocation2]   ;;  %s17_s14 = int_to_ptr.hbm [resolvable:$true] %s16_s14 }
   0x3   :  { %s18_s16 = sshll.u32 %s198_s15, 4  ;;  %s26_s19 = sshll.u32 %s236_s1, 4  ;;  %s19_s16 = int_to_ptr.vmem [resolvable:$true] %s18_s16  ;;  %s27_s19 = int_to_ptr.hbm [resolvable:$true] %s26_s19 }
   0x4   :  { %21 = dma.hbm_to_vmem [thread:$0]  %s17_s14, 64, %s19_s16, [#allocation3]  }
   0x5   :  { %s199_s20 = smov [#allocation5]   ;;  %s200_s22 = smov 64  }
   0x6   :  { %s28_s21 = sshll.u32 %s199_s20, 4  ;;  %s201_s23 = smov 4   ;;  %s29_s21 = int_to_ptr.vmem [resolvable:$true] %s28_s21 }
   0x7   :  { %34 = dma.hbm_to_vmem [thread:$0]  %s27_s19, 256, %s29_s21, [#allocation6], %s200_s22, %s200_s22, %s201_s23  }
   0x8   :  { %192 = dma.done.wait [#allocation3], 64  }
   0x9   :  { %193 = vsyncadd [#allocation3], 4294967232 }
   0xa   :  { %194 = dma.done.wait [#allocation6], 256  }
   0xb   :  { %195 = vsyncadd [#allocation6], 4294967040  ;;  %v113_v0 = vld [vmem:[#allocation5 + $0x8] sm:$0xff]  ;;  %v112_v1 = vld [vmem:[#allocation5] sm:$0xff]  ;;  %vm67_vm0 = vcmask 261120   ;;  %s202_s24 = smov [#allocation7]  }
   0xc   :  { %77 = vmatpush.bf16.msra.mxu0 %v113_v0  ;;  %v46_v2 = vld [vmem:[#allocation2] sm:$0xf]  ;;  %s90_s25 = sshll.u32 %s202_s24, 4  ;;  %s92_s28 = sshll.u32 %s238_s3, 4  ;;  %s91_s25 = int_to_ptr.vmem [resolvable:$true] %s90_s25  ;;  %s93_s28 = int_to_ptr.hbm [resolvable:$true] %s92_s28 }
   0xd   :  { %v119_v3 = vld [vmem:[%s237_s2] ss:$0 sm:$0xff] }
  0x10   :  { %78 = vmatpush.bf16.msra.mxu0 %v112_v1 }
  0x13   :  { %111 = vmatmul.msk.bf16.vlgmr.msra.gmra.mxu0 %vm67_vm0, %v46_v2 }
  0x90   :  { %v80_v4 = vpop.f32.mrf.mxu0 }
  0x91   :  { %v81_v5 = vadd.f32 %v119_v3, %v80_v4 }
  0x93   :  { %84 = vst [vmem:[#allocation7] sm:$0xff] %v81_v5 }
  0x94   :  { %95 = dma.vmem_to_hbm [thread:$0]  %s91_s25, 128, %s93_s28, [#allocation4]  }
  0x98   :  { %v82_v6 = vpop.f32.mrf.mxu0 }
  0x99   :  { %196 = dma.done.wait [#allocation4], 128  }
  0x9a   :  { %197 = vsyncadd [#allocation4], 4294967168 }
  0x9b   :  { %100 = vsyncpa [#allocation3], 1 }
  0x9c   :  { %101 = vsyncpa [#allocation6], 1 }
  0x9d   :  { %102 = vsyncpa [#allocation4], 1 }

</bundles_post_ra>
